<compile_context>
chip_gen: v7x
topology: tpu7x:2x2x1
jax: 0.10.0
libtpu: 0.0.40
codegen_flags: <defaults>
</compile_context>

<pallas_src>
import jax
import jax.numpy as jnp
from jax.experimental import pallas as pl
from jax.experimental.pallas import tpu as pltpu


def _tile_kernel(param_ref, out_ref):
    # param_ref: (1, 308) flattened parameter (same block every grid step)
    # out_ref:   (TILE_N, 308) lane-dense output block — one flattened copy of
    #            the parameter per participant row (sublane broadcast).
    out_ref[...] = jnp.broadcast_to(param_ref[...], out_ref.shape)


def dunning_kruger_forward(param, choice):
    """Pallas equivalent of DunningKruger.forward.

    param:  (28, 11) float32 parameter tensor
    choice: 1-D array of length 28 * num_participants (values unused)
    returns: (28 * num_participants, 11) float32
    """
    rows, cols = param.shape              # (28, 11)
    flat = rows * cols                    # 308 lanes per participant
    num_participants = int(choice.shape[0] // rows)

    if num_participants == 0:
        # Zero-extent grid edge case: just return an empty result.
        return jnp.zeros((0, cols), dtype=param.dtype)

    # Lane-dense view of the parameter: (1, 308). Free contiguous reshape.
    param_flat = param.reshape(1, flat)

    # Block many participants per grid step. If N fits in one tile, the block's
    # second-to-last dim equals the full array dim (always legal); otherwise
    # TILE_N is a multiple of 8 and Pallas masks the partial last block.
    max_tile = 2048
    tile_n = num_participants if num_participants <= max_tile else max_tile
    grid = (pl.cdiv(num_participants, tile_n),)

    out2d = pl.pallas_call(
        _tile_kernel,
        out_shape=jax.ShapeDtypeStruct((num_participants, flat), param.dtype),
        grid_spec=pltpu.PrefetchScalarGridSpec(
            num_scalar_prefetch=0,
            grid=grid,
            in_specs=[
                # Full flattened parameter, same block for every grid step.
                pl.BlockSpec((1, flat), lambda i: (0, 0)),
            ],
            out_specs=pl.BlockSpec((tile_n, flat), lambda i: (i, 0)),
        ),
        compiler_params=pltpu.CompilerParams(
            dimension_semantics=("parallel",),
        ),
    )(param_flat)

    # (N, 308) -> (28*N, 11): row n*28 + r, col c maps to param[r, c],
    # identical element order to torch.Tensor.repeat(N, 1).
    return out2d.reshape(num_participants * rows, cols)


if __name__ == "__main__":
    key = jax.random.PRNGKey(0)
    k_param, k_choice = jax.random.split(key)

    # Deterministic parameter init (stands in for torch.randn(28, 11)).
    param = jax.random.normal(k_param, (28, 11), dtype=jnp.float32)

    # Synthetic data['choice']: 2 participants * 28 trials = 56 entries.
    num_participants = 2
    choice = jax.random.randint(
        k_choice, (28 * num_participants,), minval=0, maxval=11, dtype=jnp.int32
    )

    out = dunning_kruger_forward(param, choice)
    out = jax.block_until_ready(out)

    ref = jnp.tile(param, (num_participants, 1))
    assert out.shape == (28 * num_participants, 11)
    assert jnp.array_equal(out, ref)

    # Extra sanity check at a slightly larger participant count.
    n2 = 20
    choice2 = jnp.zeros((28 * n2,), dtype=jnp.int32)
    out2 = jax.block_until_ready(dunning_kruger_forward(param, choice2))
    assert jnp.array_equal(out2, jnp.tile(param, (n2, 1)))

    print("KERNEL_OK")
</pallas_src>

<mosaic_0001>
module attributes {stable_mosaic.version = 11 : i64} {
  func.func @_tile_kernel(%arg0: i32, %arg1: memref<1x308xf32, #tpu.memory_space<vmem>>, %arg2: memref<2x308xf32, #tpu.memory_space<vmem>>) attributes {dimension_semantics = [#tpu.dimension_semantics<parallel>], iteration_bounds = array<i64: 1>, scalar_prefetch = 0 : i64, scratch_operands = 0 : i64, tpu.core_type = #tpu.core_type<tc>, window_params = [{pipeline_mode = #tpu.pipeline_mode<synchronous>, transform_indices = @transform_0, window_bounds = array<i64: 1, 308>}, {transform_indices = @transform_1, window_bounds = array<i64: 2, 308>}]} {
    %c0 = arith.constant 0 : index
    %c0_0 = arith.constant 0 : index
    %0 = vector.load %arg1[%c0, %c0_0] : memref<1x308xf32, #tpu.memory_space<vmem>>, vector<1x308xf32>
    %1 = vector.shape_cast %0 : vector<1x308xf32> to vector<1x308xf32>
    %2 = vector.broadcast %1 : vector<1x308xf32> to vector<2x308xf32>
    %c0_1 = arith.constant 0 : index
    %c0_2 = arith.constant 0 : index
    %3 = vector.load %arg2[%c0_1, %c0_2] : memref<2x308xf32, #tpu.memory_space<vmem>>, vector<2x308xf32>
    tpu.vector_store %arg2[%c0_1, %c0_2], %2 {strides = array<i32>} : memref<2x308xf32, #tpu.memory_space<vmem>>, vector<2x308xf32>,
    return
  }
  func.func @transform_0(%arg0: i32) -> (i32, i32) {
    %c0_i32 = arith.constant 0 : i32
    %c0_i32_0 = arith.constant 0 : i32
    %c0_i32_1 = arith.constant 0 : i32
    return %c0_i32, %c0_i32_0 : i32, i32
  }
  func.func @transform_1(%arg0: i32) -> (i32, i32) {
    %c0_i32 = arith.constant 0 : i32
    %c0_i32_0 = arith.constant 0 : i32
    return %arg0, %c0_i32 : i32, i32
  }
}

</mosaic_0001>

<bundles_post_ra>
// kernel: tpu_custom_call.1
= control target key start
LH: loop header
LB: loop body
LE: loop exit
PB: predicated region body
PF: predicated region fallthrough
CT: control target
= control target key end

     0   :  { %6 = vsyncpa [#allocation3], 0  ;;  %s161_s0 = inlined_call_operand.hbm [shape: f32[1,308], index: 0, kind: input, shape index: {}]   ;;  %s162_s1 = inlined_call_operand.hbm [shape: f32[2,308], index: 1, kind: output, shape index: {}]  }
   0x1   :  { %7 = vsyncpa [#allocation4], 0  ;;  %s124_s6 = smov [#allocation2]   ;;  %s76_s10 = scalar_lea.hbm %s161_s0, 48 }
   0x2   :  { %s14_s7 = sshll.u32 %s124_s6, 4  ;;  %p77_p0 = scmp.ne.s32.totalorder %s161_s0, %s76_s10  ;;  %s15_s7 = int_to_ptr.vmem [resolvable:$true] %s14_s7 }
   0x3   :  { %p80_p1 = scmp.lt.u32.totalorder %s76_s10, %s161_s0 }
   0x5   :  { %p82_p2 = pnand %p80_p1, %p77_p0 }
   0x7   :  { %85 = shalt.err (!%p82_p2)
}
   0x8   :  { %s86_s15 = scalar_lea.vmem %s15_s7, 48  ;;  %s90_s16 = scalar_lea.vmem %s15_s7, 64 }
   0x9   :  { %p87_p3 = scmp.ne.s32.totalorder %s15_s7, %s86_s15  ;;  %p91_p4 = scmp.lt.s32.totalorder %s15_s7, %s15_s7 }
   0xa   :  { %p92_p5 = scmp.lt.s32.totalorder %s90_s16, %s86_s15 }
   0xc   :  { %p93_p6 = por %p92_p5, %p91_p4 }
   0xe   :  { %p94_p7 = pnand %p93_p6, %p87_p3 }
  0x10   :  { %97 = shalt.err (!%p94_p7)
}
  0x11   :  { %17 = dma.hbm_to_vmem [thread:$0]  %s161_s0, 48, %s15_s7, [#allocation3]  }
  0x12   :  { %120 = dma.done.wait [#allocation3], 48  }
  0x13   :  { %121 = vsyncadd [#allocation3], 4294967248  ;;  %v23_v0 = vlaneseq  ;;  %v125_v1 = vmov 1983009808   ;;  %v21_v9 = vld [vmem:[#allocation2] sm:$0x7] }
  0x14   :  { %v37_v2 = vunpack.c.l.s4 %v125_v1  ;;  %vm52_vm0 = vcmask 1041408   ;;  %vm53_vm1 = vcmask 1043458   ;;  %vm55_vm3 = vcmask 422916   ;;  %s126_s0 = smov [#allocation5]  }
  0x15   :  { %v24_v3 = vshrl.u32 %v23_v0, 7  ;;  %vm54_vm2 = vmor %vm53_vm1, %vm52_vm0  ;;  %s64_s19 = sshll.u32 %s126_s0, 4  ;;  %s65_s19 = int_to_ptr.vmem [resolvable:$true] %s64_s19 }
  0x16   :  { %v38_v4 = vunpack.c.0.s8 %v37_v2  ;;  %vm56_vm4 = vmor %vm55_vm3, %vm54_vm2  ;;  %s98_s20 = scalar_lea.vmem %s65_s19, 96  ;;  %p103_p9 = scmp.lt.s32.totalorder %s65_s19, %s65_s19 }
  0x17   :  { %v25_v5 = vsub.s32 0, %v24_v3  ;;  %v29_v6 = vsub.s32 1, %v24_v3  ;;  %v33_v7 = vsub.s32 2, %v24_v3  ;;  %p99_p8 = scmp.ne.s32.totalorder %s65_s19, %s98_s20  ;;  %p104_p10 = scmp.lt.s32.totalorder %s98_s20, %s98_s20 }
  0x18   :  { %v41_v8 = vsub.s32 %v38_v4, %v24_v3 }
  0x19   :  { %v26_v10 = vrot.slane %v21_v9, %v25_v5  ;;  %v30_v11 = vrot.slane %v21_v9, %v29_v6  ;;  %v34_v12 = vrot.slane %v21_v9, %v33_v7  ;;  %p105_p11 = por %p104_p10, %p103_p9 }
  0x1b   :  { %v35_v13 = vcombine.low %v26_v10, %v30_v11  ;;  %v49_v14 = vrot.slane %v34_v12, %v41_v8  ;;  %p106_p12 = pnand %p105_p11, %p99_p8 }
  0x1d   :  { %v42_v15 = vrot.slane %v35_v13, %v41_v8 }
  0x1f   :  { %v50_v16 = vcombine.low %v42_v15, %v49_v14 }
  0x21   :  { %57 = vst.msk [vmem:[#allocation5] sm:$0x3f] %vm56_vm4, %v50_v16 }
  0x22   :  { %109 = shalt.err (!%p106_p12)
}
  0x23   :  { %s110_s23 = scalar_lea.hbm %s162_s1, 96 }
  0x24   :  { %p111_p13 = scmp.ne.s32.totalorder %s162_s1, %s110_s23  ;;  %p114_p0 = scmp.lt.u32.totalorder %s110_s23, %s162_s1 }
  0x26   :  { %p116_p1 = pnand %p114_p0, %p111_p13 }
  0x28   :  { %119 = shalt.err (!%p116_p1)
}
  0x29   :  { %67 = dma.vmem_to_hbm [thread:$0]  %s65_s19, 96, %s162_s1, [#allocation4]  }
  0x2a   :  { %122 = dma.done.wait [#allocation4], 96  }
  0x2b   :  { %123 = vsyncadd [#allocation4], 4294967200 }
  0x2c   :  { %71 = vsyncpa [#allocation3], 1 }
  0x2d   :  { %72 = vsyncpa [#allocation4], 1 }

</bundles_post_ra>
